<compile_context>
chip_gen: v6e
topology: v6e:2x2x1
jax: 0.10.0
libtpu: 0.0.40
codegen_flags: <defaults>
</compile_context>

<pallas_src>
import functools

import jax
import jax.numpy as jnp
from jax.experimental import pallas as pl
from jax.experimental.pallas import tpu as pltpu

KH, KW = 3, 3
CIN_PAD = 8                                    # channels padded to one f32 sublane tile
BIAS_CH = 3                                    # zero-padded channel re-purposed to carry the bias
K = KH * KW * CIN_PAD                          # im2col contraction length (72)
BIAS_COL = (1 * KW + 1) * CIN_PAD + BIAS_CH    # center tap, channel BIAS_CH -> column 35


def conv_relu_kernel(x_ref, w_ref, o_ref, patches_ref, *, H, W, nb):
    # x_ref:       (nb, CIN_PAD, Lp)   pre-ReLU input, zero padded, spatially
    #                                  flattened with row stride Wp = W + 2 and H + 3 rows
    # w_ref:       (Cout, K)           (kh, kw, c)-ordered; col BIAS_COL holds bias - 1.1
    # o_ref:       (1, Cout, nb*Lout)  lane-dense output slab, Lout = H * Wp
    # patches_ref: (K, nb*Lout)        VMEM scratch for the im2col slab
    Wp = W + 2
    Lp = (H + 3) * Wp
    Lout = H * Wp

    # v1 = relu(x): hoisted, applied exactly once per element (relu(0) = 0, so
    # applying it after zero padding is safe).  Channel BIAS_CH was zero padded;
    # overwrite it with 1.0 so (bias - 1.1) rides the matmul through
    # w_ref[:, BIAS_COL] -- no separate bias operand / broadcast-add needed.
    chan = jax.lax.broadcasted_iota(jnp.int32, (CIN_PAD, Lp), 0)     # (CIN_PAD, Lp)
    x = jnp.where(chan == BIAS_CH, 1.0, jnp.maximum(x_ref[...], 0.0))  # (nb, CIN_PAD, Lp)

    # im2col: every 3x3 tap of the flattened padded image is a constant lane
    # offset window.  Write the 9 taps of every image directly into the VMEM
    # scratch slab (covers all K rows and all nb*Lout lanes; no temporaries).
    for n in range(nb):
        for kh in range(KH):
            for kw in range(KW):
                off = kh * Wp + kw
                row = (kh * KW + kw) * CIN_PAD
                patches_ref[row:row + CIN_PAD, n * Lout:(n + 1) * Lout] = (
                    x[n, :, off:off + Lout])

    # v2 = conv (+ folded bias - 1.1): ONE MXU matmul over the whole block.
    acc = jnp.dot(w_ref[...], patches_ref[...],
                  preferred_element_type=jnp.float32)                # (Cout, nb*Lout)

    # v4 = relu(v3): lane-dense slab store.
    o_ref[0] = jnp.maximum(acc, 0.0).astype(o_ref.dtype)


def prepare_conv_params(w_oihw, bias):
    """One-time parameter prep (hoisted out of the per-call path).

    (Cout, Cin, 3, 3), (Cout,) -> (Cout, K) with (kh, kw, c)-ordered,
    channel-padded columns and the fused (bias - 1.1) folded into BIAS_COL.
    """
    Cout, Cin = w_oihw.shape[:2]
    w_pad = jnp.pad(w_oihw, ((0, 0), (0, CIN_PAD - Cin), (0, 0), (0, 0)))
    w_mat = jnp.transpose(w_pad, (0, 2, 3, 1)).reshape(Cout, K)
    w_mat = w_mat.at[:, BIAS_COL].set(bias - 1.1)
    return w_mat


def model_forward(x_nchw, w_mat, *, images_per_block=None):
    """Fused relu -> conv3x3(pad=1) -> (-1.1) -> relu.

    x_nchw: (N, Cin, H, W).  w_mat: prepared (Cout, K) from prepare_conv_params.
    images_per_block: images per grid step.  Default = whole batch (one step),
      best on single-TensorCore chips (v5e/v6e); on v7x pass N // 2 so both
      TensorCores get a grid step.
    """
    N, Cin, H, W = x_nchw.shape
    Cout = w_mat.shape[0]
    Wp = W + 2
    Lp = (H + 3) * Wp           # 1 top + 2 bottom pad rows keep every tap window in bounds
    Lout = H * Wp

    nb = N if images_per_block is None else images_per_block
    assert N % nb == 0, "images_per_block must divide the batch"
    num_blocks = N // nb

    # Layout plumbing only: zero-pad channels 3->8 (sublane tile) and spatial
    # (1,2)/(1,1), then flatten the padded spatial dims (contiguous reshape).
    # TODO(synk): at large H,W fuse this pad into the kernel via a manual DMA
    # into a zeroed VMEM scratch and add an H-row tiling grid axis (VMEM limit).
    x_pad = jnp.pad(x_nchw, ((0, 0), (0, CIN_PAD - Cin), (1, 2), (1, 1)))
    x_flat = x_pad.reshape(N, CIN_PAD, Lp)

    kernel = functools.partial(conv_relu_kernel, H=H, W=W, nb=nb)
    out = pl.pallas_call(
        kernel,
        out_shape=jax.ShapeDtypeStruct((num_blocks, Cout, nb * Lout), x_nchw.dtype),
        grid=(num_blocks,),
        in_specs=[
            pl.BlockSpec((nb, CIN_PAD, Lp), lambda g: (g, 0, 0)),
            pl.BlockSpec((Cout, K), lambda g: (0, 0)),
        ],
        out_specs=pl.BlockSpec((1, Cout, nb * Lout), lambda g: (g, 0, 0)),
        scratch_shapes=[pltpu.VMEM((K, nb * Lout), jnp.float32)],
        compiler_params=pltpu.CompilerParams(dimension_semantics=("parallel",)),
    )(x_flat, w_mat)

    # Un-flatten the lane-dense slab and drop the 2 junk columns per row that
    # the padded-width stride introduces (fused by XLA into one small copy).
    out = out.reshape(num_blocks, Cout, nb, H, Wp)
    out = jnp.transpose(out, (0, 2, 1, 3, 4)).reshape(N, Cout, H, Wp)
    return out[:, :, :, :W]


if __name__ == "__main__":
    # Small shapes consistent with the module: Cin=3, Cout=64, 3x3 conv, pad=1.
    N, Cin, H, W = 2, 3, 16, 16
    Cout = 64

    key = jax.random.PRNGKey(0)
    kx, kwt, kb = jax.random.split(key, 3)

    x = jax.random.normal(kx, (N, Cin, H, W), dtype=jnp.float32)
    # Deterministic Conv2d-like uniform fan-in init.
    fan_in = Cin * KH * KW
    bound = 1.0 / jnp.sqrt(fan_in)
    w = jax.random.uniform(kwt, (Cout, Cin, KH, KW), jnp.float32, -bound, bound)
    b = jax.random.uniform(kb, (Cout,), jnp.float32, -bound, bound)

    # One-time weight/bias preparation (not in the per-call path).
    w_mat = jax.block_until_ready(prepare_conv_params(w, b))

    fwd = jax.jit(model_forward)
    out = fwd(x, w_mat)
    jax.block_until_ready(out)

    # Cross-check against a pure-JAX reference of the same forward pass.
    ref = jax.lax.conv_general_dilated(
        jnp.maximum(x, 0.0), w, window_strides=(1, 1), padding=((1, 1), (1, 1)),
        dimension_numbers=("NCHW", "OIHW", "NCHW"))
    ref = jnp.maximum(ref + b.reshape(1, Cout, 1, 1) - 1.1, 0.0)
    assert out.shape == (N, Cout, H, W)
    assert jnp.allclose(out, ref, atol=1e-4, rtol=1e-4)

    print("KERNEL_OK")
</pallas_src>

<mosaic_0001>
module attributes {stable_mosaic.version = 11 : i64} {
  func.func @conv_relu_kernel(%arg0: i32, %arg1: memref<2x8x342xf32, #tpu.memory_space<vmem>>, %arg2: memref<64x72xf32, #tpu.memory_space<vmem>>, %arg3: memref<1x64x576xf32, #tpu.memory_space<vmem>>, %arg4: memref<72x576xf32, #tpu.memory_space<vmem>>) attributes {dimension_semantics = [#tpu.dimension_semantics<parallel>], iteration_bounds = array<i64: 1>, scalar_prefetch = 0 : i64, scratch_operands = 1 : i64, tpu.core_type = #tpu.core_type<tc>, window_params = [{transform_indices = @transform_0, window_bounds = array<i64: 2, 8, 342>}, {pipeline_mode = #tpu.pipeline_mode<synchronous>, transform_indices = @transform_1, window_bounds = array<i64: 64, 72>}, {transform_indices = @transform_2, window_bounds = array<i64: 1, 64, 576>}]} {
    %0 = tpu.iota {dimensions = array<i32: 0>} : vector<8x342xi32>
    %c3_i32 = arith.constant 3 : i32
    %1 = vector.broadcast %c3_i32 : i32 to vector<8x342xi32>
    %2 = arith.cmpi eq, %0, %1 : vector<8x342xi32>
    %c0 = arith.constant 0 : index
    %c0_0 = arith.constant 0 : index
    %c0_1 = arith.constant 0 : index
    %3 = vector.load %arg1[%c0, %c0_0, %c0_1] : memref<2x8x342xf32, #tpu.memory_space<vmem>>, vector<2x8x342xf32>
    %cst = arith.constant 0.000000e+00 : f32
    %4 = vector.broadcast %cst : f32 to vector<2x8x342xf32>
    %5 = arith.maximumf %3, %4 : vector<2x8x342xf32>
    %cst_2 = arith.constant 1.000000e+00 : f32
    %6 = vector.shape_cast %2 : vector<8x342xi1> to vector<1x8x342xi1>
    %7 = vector.broadcast %6 : vector<1x8x342xi1> to vector<2x8x342xi1>
    %8 = vector.broadcast %cst_2 : f32 to vector<2x8x342xf32>
    %9 = arith.select %7, %8, %5 : vector<2x8x342xi1>, vector<2x8x342xf32>
    %10 = vector.extract_strided_slice %9 {offsets = [0, 0, 0], sizes = [1, 8, 288], strides = [1, 1, 1]} : vector<2x8x342xf32> to vector<1x8x288xf32>
    %11 = vector.shape_cast %10 : vector<1x8x288xf32> to vector<8x288xf32>
    %c0_3 = arith.constant 0 : index
    %c0_4 = arith.constant 0 : index
    %12 = vector.load %arg4[%c0_3, %c0_4] : memref<72x576xf32, #tpu.memory_space<vmem>>, vector<8x288xf32>
    tpu.vector_store %arg4[%c0_3, %c0_4], %11 {strides = array<i32>} : memref<72x576xf32, #tpu.memory_space<vmem>>, vector<8x288xf32>,
    %13 = vector.extract_strided_slice %9 {offsets = [0, 0, 1], sizes = [1, 8, 288], strides = [1, 1, 1]} : vector<2x8x342xf32> to vector<1x8x288xf32>
    %14 = vector.shape_cast %13 : vector<1x8x288xf32> to vector<8x288xf32>
    %c8 = arith.constant 8 : index
    %c0_5 = arith.constant 0 : index
    %15 = vector.load %arg4[%c8, %c0_5] : memref<72x576xf32, #tpu.memory_space<vmem>>, vector<8x288xf32>
    tpu.vector_store %arg4[%c8, %c0_5], %14 {strides = array<i32>} : memref<72x576xf32, #tpu.memory_space<vmem>>, vector<8x288xf32>,
    %16 = vector.extract_strided_slice %9 {offsets = [0, 0, 2], sizes = [1, 8, 288], strides = [1, 1, 1]} : vector<2x8x342xf32> to vector<1x8x288xf32>
    %17 = vector.shape_cast %16 : vector<1x8x288xf32> to vector<8x288xf32>
    %c16 = arith.constant 16 : index
    %c0_6 = arith.constant 0 : index
    %18 = vector.load %arg4[%c16, %c0_6] : memref<72x576xf32, #tpu.memory_space<vmem>>, vector<8x288xf32>
    tpu.vector_store %arg4[%c16, %c0_6], %17 {strides = array<i32>} : memref<72x576xf32, #tpu.memory_space<vmem>>, vector<8x288xf32>,
    %19 = vector.extract_strided_slice %9 {offsets = [0, 0, 18], sizes = [1, 8, 288], strides = [1, 1, 1]} : vector<2x8x342xf32> to vector<1x8x288xf32>
    %20 = vector.shape_cast %19 : vector<1x8x288xf32> to vector<8x288xf32>
    %c24 = arith.constant 24 : index
    %c0_7 = arith.constant 0 : index
    %21 = vector.load %arg4[%c24, %c0_7] : memref<72x576xf32, #tpu.memory_space<vmem>>, vector<8x288xf32>
    tpu.vector_store %arg4[%c24, %c0_7], %20 {strides = array<i32>} : memref<72x576xf32, #tpu.memory_space<vmem>>, vector<8x288xf32>,
    %22 = vector.extract_strided_slice %9 {offsets = [0, 0, 19], sizes = [1, 8, 288], strides = [1, 1, 1]} : vector<2x8x342xf32> to vector<1x8x288xf32>
    %23 = vector.shape_cast %22 : vector<1x8x288xf32> to vector<8x288xf32>
    %c32 = arith.constant 32 : index
    %c0_8 = arith.constant 0 : index
    %24 = vector.load %arg4[%c32, %c0_8] : memref<72x576xf32, #tpu.memory_space<vmem>>, vector<8x288xf32>
    tpu.vector_store %arg4[%c32, %c0_8], %23 {strides = array<i32>} : memref<72x576xf32, #tpu.memory_space<vmem>>, vector<8x288xf32>,
    %25 = vector.extract_strided_slice %9 {offsets = [0, 0, 20], sizes = [1, 8, 288], strides = [1, 1, 1]} : vector<2x8x342xf32> to vector<1x8x288xf32>
    %26 = vector.shape_cast %25 : vector<1x8x288xf32> to vector<8x288xf32>
    %c40 = arith.constant 40 : index
    %c0_9 = arith.constant 0 : index
    %27 = vector.load %arg4[%c40, %c0_9] : memref<72x576xf32, #tpu.memory_space<vmem>>, vector<8x288xf32>
    tpu.vector_store %arg4[%c40, %c0_9], %26 {strides = array<i32>} : memref<72x576xf32, #tpu.memory_space<vmem>>, vector<8x288xf32>,
    %28 = vector.extract_strided_slice %9 {offsets = [0, 0, 36], sizes = [1, 8, 288], strides = [1, 1, 1]} : vector<2x8x342xf32> to vector<1x8x288xf32>
    %29 = vector.shape_cast %28 : vector<1x8x288xf32> to vector<8x288xf32>
    %c48 = arith.constant 48 : index
    %c0_10 = arith.constant 0 : index
    %30 = vector.load %arg4[%c48, %c0_10] : memref<72x576xf32, #tpu.memory_space<vmem>>, vector<8x288xf32>
    tpu.vector_store %arg4[%c48, %c0_10], %29 {strides = array<i32>} : memref<72x576xf32, #tpu.memory_space<vmem>>, vector<8x288xf32>,
    %31 = vector.extract_strided_slice %9 {offsets = [0, 0, 37], sizes = [1, 8, 288], strides = [1, 1, 1]} : vector<2x8x342xf32> to vector<1x8x288xf32>
    %32 = vector.shape_cast %31 : vector<1x8x288xf32> to vector<8x288xf32>
    %c56 = arith.constant 56 : index
    %c0_11 = arith.constant 0 : index
    %33 = vector.load %arg4[%c56, %c0_11] : memref<72x576xf32, #tpu.memory_space<vmem>>, vector<8x288xf32>
    tpu.vector_store %arg4[%c56, %c0_11], %32 {strides = array<i32>} : memref<72x576xf32, #tpu.memory_space<vmem>>, vector<8x288xf32>,
    %34 = vector.extract_strided_slice %9 {offsets = [0, 0, 38], sizes = [1, 8, 288], strides = [1, 1, 1]} : vector<2x8x342xf32> to vector<1x8x288xf32>
    %35 = vector.shape_cast %34 : vector<1x8x288xf32> to vector<8x288xf32>
    %c64 = arith.constant 64 : index
    %c0_12 = arith.constant 0 : index
    %36 = vector.load %arg4[%c64, %c0_12] : memref<72x576xf32, #tpu.memory_space<vmem>>, vector<8x288xf32>
    tpu.vector_store %arg4[%c64, %c0_12], %35 {strides = array<i32>} : memref<72x576xf32, #tpu.memory_space<vmem>>, vector<8x288xf32>,
    %37 = vector.extract_strided_slice %9 {offsets = [1, 0, 0], sizes = [1, 8, 288], strides = [1, 1, 1]} : vector<2x8x342xf32> to vector<1x8x288xf32>
    %38 = vector.shape_cast %37 : vector<1x8x288xf32> to vector<8x288xf32>
    %c0_13 = arith.constant 0 : index
    %c288 = arith.constant 288 : index
    %39 = vector.load %arg4[%c0_13, %c288] : memref<72x576xf32, #tpu.memory_space<vmem>>, vector<8x288xf32>
    tpu.vector_store %arg4[%c0_13, %c288], %38 {strides = array<i32>} : memref<72x576xf32, #tpu.memory_space<vmem>>, vector<8x288xf32>,
    %40 = vector.extract_strided_slice %9 {offsets = [1, 0, 1], sizes = [1, 8, 288], strides = [1, 1, 1]} : vector<2x8x342xf32> to vector<1x8x288xf32>
    %41 = vector.shape_cast %40 : vector<1x8x288xf32> to vector<8x288xf32>
    %c8_14 = arith.constant 8 : index
    %c288_15 = arith.constant 288 : index
    %42 = vector.load %arg4[%c8_14, %c288_15] : memref<72x576xf32, #tpu.memory_space<vmem>>, vector<8x288xf32>
    tpu.vector_store %arg4[%c8_14, %c288_15], %41 {strides = array<i32>} : memref<72x576xf32, #tpu.memory_space<vmem>>, vector<8x288xf32>,
    %43 = vector.extract_strided_slice %9 {offsets = [1, 0, 2], sizes = [1, 8, 288], strides = [1, 1, 1]} : vector<2x8x342xf32> to vector<1x8x288xf32>
    %44 = vector.shape_cast %43 : vector<1x8x288xf32> to vector<8x288xf32>
    %c16_16 = arith.constant 16 : index
    %c288_17 = arith.constant 288 : index
    %45 = vector.load %arg4[%c16_16, %c288_17] : memref<72x576xf32, #tpu.memory_space<vmem>>, vector<8x288xf32>
    tpu.vector_store %arg4[%c16_16, %c288_17], %44 {strides = array<i32>} : memref<72x576xf32, #tpu.memory_space<vmem>>, vector<8x288xf32>,
    %46 = vector.extract_strided_slice %9 {offsets = [1, 0, 18], sizes = [1, 8, 288], strides = [1, 1, 1]} : vector<2x8x342xf32> to vector<1x8x288xf32>
    %47 = vector.shape_cast %46 : vector<1x8x288xf32> to vector<8x288xf32>
    %c24_18 = arith.constant 24 : index
    %c288_19 = arith.constant 288 : index
    %48 = vector.load %arg4[%c24_18, %c288_19] : memref<72x576xf32, #tpu.memory_space<vmem>>, vector<8x288xf32>
    tpu.vector_store %arg4[%c24_18, %c288_19], %47 {strides = array<i32>} : memref<72x576xf32, #tpu.memory_space<vmem>>, vector<8x288xf32>,
    %49 = vector.extract_strided_slice %9 {offsets = [1, 0, 19], sizes = [1, 8, 288], strides = [1, 1, 1]} : vector<2x8x342xf32> to vector<1x8x288xf32>
    %50 = vector.shape_cast %49 : vector<1x8x288xf32> to vector<8x288xf32>
    %c32_20 = arith.constant 32 : index
    %c288_21 = arith.constant 288 : index
    %51 = vector.load %arg4[%c32_20, %c288_21] : memref<72x576xf32, #tpu.memory_space<vmem>>, vector<8x288xf32>
    tpu.vector_store %arg4[%c32_20, %c288_21], %50 {strides = array<i32>} : memref<72x576xf32, #tpu.memory_space<vmem>>, vector<8x288xf32>,
    %52 = vector.extract_strided_slice %9 {offsets = [1, 0, 20], sizes = [1, 8, 288], strides = [1, 1, 1]} : vector<2x8x342xf32> to vector<1x8x288xf32>
    %53 = vector.shape_cast %52 : vector<1x8x288xf32> to vector<8x288xf32>
    %c40_22 = arith.constant 40 : index
    %c288_23 = arith.constant 288 : index
    %54 = vector.load %arg4[%c40_22, %c288_23] : memref<72x576xf32, #tpu.memory_space<vmem>>, vector<8x288xf32>
    tpu.vector_store %arg4[%c40_22, %c288_23], %53 {strides = array<i32>} : memref<72x576xf32, #tpu.memory_space<vmem>>, vector<8x288xf32>,
    %55 = vector.extract_strided_slice %9 {offsets = [1, 0, 36], sizes = [1, 8, 288], strides = [1, 1, 1]} : vector<2x8x342xf32> to vector<1x8x288xf32>
    %56 = vector.shape_cast %55 : vector<1x8x288xf32> to vector<8x288xf32>
    %c48_24 = arith.constant 48 : index
    %c288_25 = arith.constant 288 : index
    %57 = vector.load %arg4[%c48_24, %c288_25] : memref<72x576xf32, #tpu.memory_space<vmem>>, vector<8x288xf32>
    tpu.vector_store %arg4[%c48_24, %c288_25], %56 {strides = array<i32>} : memref<72x576xf32, #tpu.memory_space<vmem>>, vector<8x288xf32>,
    %58 = vector.extract_strided_slice %9 {offsets = [1, 0, 37], sizes = [1, 8, 288], strides = [1, 1, 1]} : vector<2x8x342xf32> to vector<1x8x288xf32>
    %59 = vector.shape_cast %58 : vector<1x8x288xf32> to vector<8x288xf32>
    %c56_26 = arith.constant 56 : index
    %c288_27 = arith.constant 288 : index
    %60 = vector.load %arg4[%c56_26, %c288_27] : memref<72x576xf32, #tpu.memory_space<vmem>>, vector<8x288xf32>
    tpu.vector_store %arg4[%c56_26, %c288_27], %59 {strides = array<i32>} : memref<72x576xf32, #tpu.memory_space<vmem>>, vector<8x288xf32>,
    %61 = vector.extract_strided_slice %9 {offsets = [1, 0, 38], sizes = [1, 8, 288], strides = [1, 1, 1]} : vector<2x8x342xf32> to vector<1x8x288xf32>
    %62 = vector.shape_cast %61 : vector<1x8x288xf32> to vector<8x288xf32>
    %c64_28 = arith.constant 64 : index
    %c288_29 = arith.constant 288 : index
    %63 = vector.load %arg4[%c64_28, %c288_29] : memref<72x576xf32, #tpu.memory_space<vmem>>, vector<8x288xf32>
    tpu.vector_store %arg4[%c64_28, %c288_29], %62 {strides = array<i32>} : memref<72x576xf32, #tpu.memory_space<vmem>>, vector<8x288xf32>,
    %c0_30 = arith.constant 0 : index
    %c0_31 = arith.constant 0 : index
    %64 = vector.load %arg2[%c0_30, %c0_31] : memref<64x72xf32, #tpu.memory_space<vmem>>, vector<64x72xf32>
    %c0_32 = arith.constant 0 : index
    %c0_33 = arith.constant 0 : index
    %65 = vector.load %arg4[%c0_32, %c0_33] : memref<72x576xf32, #tpu.memory_space<vmem>>, vector<72x576xf32>
    %cst_34 = arith.constant dense<0.000000e+00> : vector<64x576xf32>
    %66 = tpu.matmul %64, %65, %cst_34 {dimension_numbers = #tpu.dot_dimension_numbers<[1], [0], [0], [1], [0, 0, 1, 1], [], []>} : vector<64x72xf32>, vector<72x576xf32>, vector<64x576xf32> -> vector<64x576xf32>
    %cst_35 = arith.constant 0.000000e+00 : f32
    %67 = vector.broadcast %cst_35 : f32 to vector<64x576xf32>
    %68 = arith.maximumf %66, %67 : vector<64x576xf32>
    %c0_36 = arith.constant 0 : index
    %c0_37 = arith.constant 0 : index
    %c0_38 = arith.constant 0 : index
    %69 = vector.load %arg3[%c0_36, %c0_37, %c0_38] : memref<1x64x576xf32, #tpu.memory_space<vmem>>, vector<1x64x576xf32>
    %70 = vector.shape_cast %69 : vector<1x64x576xf32> to vector<64x576xf32>
    %71 = vector.shape_cast %68 : vector<64x576xf32> to vector<1x64x576xf32>
    tpu.vector_store %arg3[%c0_36, %c0_37, %c0_38], %71 {strides = array<i32>} : memref<1x64x576xf32, #tpu.memory_space<vmem>>, vector<1x64x576xf32>,
    return
  }
  func.func @transform_0(%arg0: i32) -> (i32, i32, i32) {
    %c0_i32 = arith.constant 0 : i32
    %c0_i32_0 = arith.constant 0 : i32
    %c0_i32_1 = arith.constant 0 : i32
    return %arg0, %c0_i32, %c0_i32_0 : i32, i32, i32
  }
  func.func @transform_1(%arg0: i32) -> (i32, i32) {
    %c0_i32 = arith.constant 0 : i32
    %c0_i32_0 = arith.constant 0 : i32
    %c0_i32_1 = arith.constant 0 : i32
    return %c0_i32, %c0_i32_0 : i32, i32
  }
  func.func @transform_2(%arg0: i32) -> (i32, i32, i32) {
    %c0_i32 = arith.constant 0 : i32
    %c0_i32_0 = arith.constant 0 : i32
    %c0_i32_1 = arith.constant 0 : i32
    return %arg0, %c0_i32, %c0_i32_0 : i32, i32, i32
  }
}

</mosaic_0001>

<bundles_post_ra>
// kernel: model_forward.1
= control target key start
LH: loop header
LB: loop body
LE: loop exit
PB: predicated region body
PF: predicated region fallthrough
CT: control target
= control target key end

     0   :  { %v11_v0 = vlaneseq  ;;  %vm36_vm1 = vcmask 261120   ;;  %s900_s21 = smov 122   ;;  %s901_s22 = smov 90   ;;  %v914_v20 = vmov 0.0   ;;  %vm178_vm2 = vcmask 523264   ;;  %s1279_s0 = inlined_call_operand.vmem [shape: f32[2,8,342], index: 0, kind: input, shape index: {}]   ;;  %s1280_s1 = inlined_call_operand.vmem [shape: f32[64,72], index: 1, kind: input, shape index: {}]   ;;  %s1281_s2 = inlined_call_operand.vmem [shape: f32[1,64,576], index: 2, kind: output, shape index: {}]  }
   0x1   :  { %v18_v1 = vld [vmem:[%s1279_s0 + $0x20] sm:$0xff]  ;;  %v15_v2 = vld [vmem:[%s1279_s0 + $0x8] sm:$0xff]  ;;  %v16_v7 = vld [vmem:[%s1279_s0 + $0x10] sm:$0xff]  ;;  %s903_s23 = smov 123   ;;  %s904_s24 = smov 92   ;;  %442 = vmatprep.mubr.f32.mxu0 %v914_v20  ;;  %555 = vmatprep.mubr.f32.mxu1 %v914_v20  ;;  %vm291_vm3 = vcmask 998400  }
   0x2   :  { %v19_v3 = vld [vmem:[%s1279_s0 + $0x28] sm:$0xff]  ;;  %v12_v4 = vshrl.u32 %v11_v0, 7  ;;  %v24_v5 = vmax.f32 %v18_v1, 0.0  ;;  %v21_v6 = vmax.f32 %v15_v2, 0.0  ;;  %v22_v9 = vmax.f32 %v16_v7, 0.0  ;;  %v14_v10 = vld [vmem:[%s1279_s0] sm:$0xff] }
   0x3   :  { %v25_v8 = vmax.f32 %v19_v3, 0.0  ;;  %v17_v11 = vld [vmem:[%s1279_s0 + $0x18] sm:$0xff]  ;;  %v20_v12 = vmax.f32 %v14_v10, 0.0  ;;  %s902_s0 = smov 91   ;;  %s905_s25 = smov 124   ;;  %vm152_vm4 = vcmask 736256  }
   0x4   :  { %vm13_vm0 = vcmp.eq.s32.totalorder %v12_v4, 3  ;;  %v23_v18 = vmax.f32 %v17_v11, 0.0  ;;  %s906_s26 = smov 108   ;;  %s907_s27 = smov 12   ;;  %vm175_vm5 = vcmask 1047808   ;;  %vm137_vm6 = vcmask 744448  }
   0x5   :  { %v952_v13 = vsel %vm13_vm0, 1.0, %v24_v5  ;;  %v955_v14 = vsel %vm13_vm0, 1.0, %v21_v6  ;;  %v30_v15 = vsel %vm13_vm0, 1.0, %v22_v9  ;;  %v961_v16 = vsel %vm13_vm0, 1.0, %v20_v12  ;;  %s908_s28 = smov 109   ;;  %s909_s29 = smov 13  }
   0x6   :  { %287 = vrot.lane.b32.xlu1 %v952_v13, %s900_s21  ;;  %148 = vrot.lane.b32.xlu0 %v955_v14, %s901_s22  ;;  %37 = vst.msk [vmem:[#allocation2 + $0x10] sm:$0xff] %vm36_vm1, %v30_v15  ;;  %v965_v17 = vsel %vm13_vm0, 1.0, %v25_v8  ;;  %v31_v19 = vsel %vm13_vm0, 1.0, %v23_v18  ;;  %s910_s30 = smov 110   ;;  %s911_s3 = smov 14   ;;  %vm276_vm7 = vcmask 1006592  }
   0x7   :  { %s912_s4 = smov 126   ;;  %s913_s5 = smov 30   ;;  %vm122_vm8 = vcmask 752640   ;;  %vm261_vm9 = vcmask 1014784   ;;  %vm107_vm10 = vcmask 883712   ;;  %vm246_vm11 = vcmask 97280  }
   0x8   :  { %s915_s6 = smov 127   ;;  %s916_s7 = smov 31   ;;  %vm92_vm12 = vcmask 891904   ;;  %vm231_vm13 = vcmask 105472   ;;  %vm77_vm14 = vcmask 900096   ;;  %vm216_vm15 = vcmask 113664  }
   0x9   :  { %s917_s8 = smov 32   ;;  %vm62_vm0 = vcmask 1031168  }
   0xa   :  { %289 = vrot.lane.b32.xlu1 %v965_v17, %s900_s21  ;;  %150 = vrot.lane.b32.xlu0 %v30_v15, %s901_s22 }
   0xe   :  { %285 = vrot.lane.b32.xlu1 %v31_v19, %s900_s21  ;;  %146 = vrot.lane.b32.xlu0 %v961_v16, %s901_s22 }
  0x12   :  { %135 = vrot.lane.b32.xlu1 %v30_v15, %s902_s0  ;;  %133 = vrot.lane.b32.xlu0 %v955_v14, %s902_s0 }
  0x16   :  { %274 = vrot.lane.b32.xlu1 %v965_v17, %s903_s23  ;;  %272 = vrot.lane.b32.xlu0 %v952_v13, %s903_s23 }
  0x1a   :  { %270 = vrot.lane.b32.xlu1 %v31_v19, %s903_s23  ;;  %131 = vrot.lane.b32.xlu0 %v961_v16, %s902_s0 }
  0x1e   :  { %120 = vrot.lane.b32.xlu1 %v30_v15, %s904_s24  ;;  %118 = vrot.lane.b32.xlu0 %v955_v14, %s904_s24 }
  0x22   :  { %259 = vrot.lane.b32.xlu1 %v965_v17, %s905_s25  ;;  %257 = vrot.lane.b32.xlu0 %v952_v13, %s905_s25 }
  0x26   :  { %255 = vrot.lane.b32.xlu1 %v31_v19, %s905_s25  ;;  %116 = vrot.lane.b32.xlu0 %v961_v16, %s904_s24 }
  0x2a   :  { %105 = vrot.lane.b32.xlu1 %v30_v15, %s906_s26  ;;  %103 = vrot.lane.b32.xlu0 %v955_v14, %s906_s26 }
  0x2e   :  { %242 = vrot.lane.b32.xlu1 %v952_v13, %s907_s27  ;;  %240 = vrot.lane.b32.xlu0 %v31_v19, %s907_s27 }
  0x32   :  { %88 = vrot.lane.b32.xlu1 %v955_v14, %s908_s28  ;;  %101 = vrot.lane.b32.xlu0 %v961_v16, %s906_s26 }
  0x36   :  { %225 = vrot.lane.b32.xlu1 %v31_v19, %s909_s29  ;;  %90 = vrot.lane.b32.xlu0 %v30_v15, %s908_s28 }
  0x3a   :  { %86 = vrot.lane.b32.xlu1 %v961_v16, %s908_s28  ;;  %227 = vrot.lane.b32.xlu0 %v952_v13, %s909_s29 }
  0x3e   :  { %75 = vrot.lane.b32.xlu1 %v30_v15, %s910_s30  ;;  %73 = vrot.lane.b32.xlu0 %v955_v14, %s910_s30 }
  0x42   :  { %212 = vrot.lane.b32.xlu1 %v952_v13, %s911_s3  ;;  %210 = vrot.lane.b32.xlu0 %v31_v19, %s911_s3 }
  0x46   :  { %58 = vrot.lane.b32.xlu1 %v955_v14, %s912_s4  ;;  %71 = vrot.lane.b32.xlu0 %v961_v16, %s910_s30 }
  0x4a   :  { %195 = vrot.lane.b32.xlu1 %v31_v19, %s913_s5  ;;  %60 = vrot.lane.b32.xlu0 %v30_v15, %s912_s4 }
  0x4e   :  { %56 = vrot.lane.b32.xlu1 %v961_v16, %s912_s4  ;;  %197 = vrot.lane.b32.xlu0 %v952_v13, %s913_s5 }
  0x52   :  { %45 = vrot.lane.b32.xlu1 %v30_v15, %s915_s6  ;;  %43 = vrot.lane.b32.xlu0 %v955_v14, %s915_s6 }
  0x56   :  { %182 = vrot.lane.b32.xlu1 %v952_v13, %s916_s7  ;;  %180 = vrot.lane.b32.xlu0 %v31_v19, %s916_s7 }
  0x5a   :  { %164 = vrot.lane.b32.xlu1 %v31_v19, %s917_s8  ;;  %41 = vrot.lane.b32.xlu0 %v961_v16, %s915_s6 }
  0x5e   :  { %244 = vrot.lane.b32.xlu1 %v965_v17, %s907_s27  ;;  %166 = vrot.lane.b32.xlu0 %v952_v13, %s917_s8 }
  0x62   :  { %214 = vrot.lane.b32.xlu1 %v965_v17, %s911_s3  ;;  %229 = vrot.lane.b32.xlu0 %v965_v17, %s909_s29 }
  0x66   :  { %184 = vrot.lane.b32.xlu1 %v965_v17, %s916_s7  ;;  %199 = vrot.lane.b32.xlu0 %v965_v17, %s913_s5 }
  0x6a   :  { %168 = vrot.lane.b32.xlu0 %v965_v17, %s917_s8 }
  0x78   :  { %v288_v21 = vpop.permute.xlu1 %287  ;;  %v149_v22 = vpop.permute.xlu0 %148 }
  0x7c   :  { %v290_v23 = vpop.permute.xlu1 %289  ;;  %v151_v24 = vpop.permute.xlu0 %150 }
  0x7d   :  { %v293_v25 = vsel %vm291_vm3, %v288_v21, %v290_v23  ;;  %299 = vst.msk [vmem:[#allocation2 + $0x160] sm:$0xff] %vm178_vm2, %v290_v23  ;;  %v154_v26 = vsel %vm152_vm4, %v149_v22, %v151_v24 }
  0x7e   :  { %160 = vst.msk [vmem:[#allocation2 + $0x150] sm:$0xff] %vm36_vm1, %v151_v24  ;;  %392 = vmatprep.subr.mxu0 %v154_v26  ;;  %505 = vmatprep.subr.mxu1 %v293_v25 }
  0x80   :  { %v286_v27 = vpop.permute.xlu1 %285  ;;  %v147_v28 = vpop.permute.xlu0 %146 }
  0x81   :  { %v292_v29 = vsel %vm291_vm3, %v286_v27, %v288_v21  ;;  %v153_v30 = vsel %vm152_vm4, %v147_v28, %v149_v22  ;;  %vm201_vm3 = vcmask 244736   ;;  %vm47_vm4 = vcmask 1039360  }
  0x82   :  { %297 = vst.msk [vmem:[#allocation2 + $0x150] sm:$0xff] %vm175_vm5, %v292_v29  ;;  %393 = vmatpush1.msra.mxu0 %v153_v30 }
  0x84   :  { %v136_v31 = vpop.permute.xlu1 %135  ;;  %v134_v32 = vpop.permute.xlu0 %133 }
  0x85   :  { %145 = vst.msk [vmem:[#allocation2 + $0x128] sm:$0xff] %vm36_vm1, %v136_v31  ;;  %v139_v33 = vsel %vm137_vm6, %v134_v32, %v136_v31 }
  0x86   :  { %394 = vmatprep.subr.mxu0 %v139_v33 }
  0x88   :  { %v275_v34 = vpop.permute.xlu1 %274  ;;  %v273_v35 = vpop.permute.xlu0 %272 }
  0x89   :  { %284 = vst.msk [vmem:[#allocation2 + $0x138] sm:$0xff] %vm178_vm2, %v275_v34  ;;  %v278_v36 = vsel %vm276_vm7, %v273_v35, %v275_v34  ;;  %v350_v37 = vld [vmem:[#allocation2 + $0x150] sm:$0xff] }
  0x8a   :  { %506 = vmatpush1.msra.mxu1 %v350_v37 }
  0x8b   :  { %507 = vmatprep.subr.mxu1 %v278_v36 }
  0x8c   :  { %v271_v38 = vpop.permute.xlu1 %270  ;;  %v132_v39 = vpop.permute.xlu0 %131 }
  0x8d   :  { %v277_v40 = vsel %vm276_vm7, %v271_v38, %v273_v35  ;;  %v138_v41 = vsel %vm137_vm6, %v132_v39, %v134_v32  ;;  %vm186_vm6 = vcmask 252928   ;;  %v1059_v38 = vld [vmem:[%s1280_s1] sm:$0xff]  ;;  %vm353_vm7 = vcmask 588800  }
  0x8e   :  { %282 = vst.msk [vmem:[#allocation2 + $0x128] sm:$0xff] %vm175_vm5, %v277_v40  ;;  %395 = vmatpush1.msra.mxu0 %v138_v41 }
  0x90   :  { %v121_v42 = vpop.permute.xlu1 %120  ;;  %v119_v43 = vpop.permute.xlu0 %118 }
  0x91   :  { %130 = vst.msk [vmem:[#allocation2 + $0x100] sm:$0xff] %vm36_vm1, %v121_v42  ;;  %v124_v44 = vsel %vm122_vm8, %v119_v43, %v121_v42  ;;  %v352_v42 = vld [vmem:[#allocation2 + $0x160] sm:$0xff] }
  0x92   :  { %396 = vmatprep.subr.mxu0 %v124_v44 }
  0x94   :  { %v260_v45 = vpop.permute.xlu1 %259  ;;  %v258_v46 = vpop.permute.xlu0 %257 }
  0x95   :  { %269 = vst.msk [vmem:[#allocation2 + $0x110] sm:$0xff] %vm178_vm2, %v260_v45  ;;  %v263_v47 = vsel %vm261_vm9, %v258_v46, %v260_v45  ;;  %v345_v48 = vld [vmem:[#allocation2 + $0x128] sm:$0xff] }
  0x96   :  { %508 = vmatpush1.msra.mxu1 %v345_v48 }
  0x97   :  { %509 = vmatprep.subr.mxu1 %v263_v47 }
  0x98   :  { %v256_v49 = vpop.permute.xlu1 %255  ;;  %v117_v50 = vpop.permute.xlu0 %116 }
  0x99   :  { %v262_v51 = vsel %vm261_vm9, %v256_v49, %v258_v46  ;;  %v123_v52 = vsel %vm122_vm8, %v117_v50, %v119_v43  ;;  %v1080_v50 = vld [vmem:[%s1280_s1 + $0x8] sm:$0xff] }
  0x9a   :  { %267 = vst.msk [vmem:[#allocation2 + $0x100] sm:$0xff] %vm175_vm5, %v262_v51  ;;  %397 = vmatpush1.msra.mxu0 %v123_v52 }
  0x9c   :  { %v106_v53 = vpop.permute.xlu1 %105  ;;  %v104_v54 = vpop.permute.xlu0 %103  ;;  %v342_v49 = vld [vmem:[#allocation2 + $0x110] sm:$0xff] }
  0x9d   :  { %115 = vst.msk [vmem:[#allocation2 + $0xd8] sm:$0xff] %vm36_vm1, %v106_v53  ;;  %v109_v55 = vsel %vm107_vm10, %v104_v54, %v106_v53 }
  0x9e   :  { %398 = vmatprep.subr.mxu0 %v109_v55 }
  0xa0   :  { %v1023_v56 = vpop.permute.xlu1 %242  ;;  %v241_v57 = vpop.permute.xlu0 %240 }
  0xa1   :  { %v247_v58 = vsel %vm246_vm11, %v241_v57, %v1023_v56  ;;  %252 = vst.msk [vmem:[#allocation2 + $0xd8] sm:$0xff] %vm175_vm5, %v241_v57  ;;  %v340_v59 = vld [vmem:[#allocation2 + $0x100] sm:$0xff] }
  0xa2   :  { %510 = vmatpush1.msra.mxu1 %v340_v59 }
  0xa3   :  { %511 = vmatprep.subr.mxu1 %v247_v58 }
  0xa4   :  { %v89_v60 = vpop.permute.xlu1 %88  ;;  %v102_v61 = vpop.permute.xlu0 %101 }
  0xa5   :  { %v108_v62 = vsel %vm107_vm10, %v102_v61, %v104_v54 }
  0xa6   :  { %399 = vmatpush1.msra.mxu0 %v108_v62  ;;  %v303_v62 = vld [vmem:[%s1280_s1 + $0x18] sm:$0xff] }
  0xa8   :  { %v226_v63 = vpop.permute.xlu1 %225  ;;  %v91_v0 = vpop.permute.xlu0 %90  ;;  %v335_v1 = vld [vmem:[#allocation2 + $0xd8] sm:$0xff] }
  0xa9   :  { %v94_v2 = vsel %vm92_vm12, %v89_v60, %v91_v0  ;;  %100 = vst.msk [vmem:[#allocation2 + $0xb0] sm:$0xff] %vm36_vm1, %v91_v0  ;;  %512 = vmatpush1.msra.mxu1 %v335_v1  ;;  %v304_v1 = vld [vmem:[%s1280_s1 + $0x20] sm:$0xff] }
  0xaa   :  { %237 = vst.msk [vmem:[#allocation2 + $0xb0] sm:$0xff] %vm175_vm5, %v226_v63  ;;  %400 = vmatprep.subr.mxu0 %v94_v2  ;;  %v305_v2 = vld [vmem:[%s1280_s1 + $0x28] sm:$0xff] }
  0xac   :  { %v87_v3 = vpop.permute.xlu1 %86  ;;  %v1031_v4 = vpop.permute.xlu0 %227 }
  0xad   :  { %v93_v5 = vsel %vm92_vm12, %v87_v3, %v89_v60  ;;  %v232_v6 = vsel %vm231_vm13, %v226_v63, %v1031_v4  ;;  %v306_v3 = vld [vmem:[%s1280_s1 + $0x30] sm:$0xff] }
  0xae   :  { %401 = vmatpush1.msra.mxu0 %v93_v5  ;;  %513 = vmatprep.subr.mxu1 %v232_v6 }
  0xb0   :  { %v76_v7 = vpop.permute.xlu1 %75  ;;  %v74_v8 = vpop.permute.xlu0 %73 }
  0xb1   :  { %85 = vst.msk [vmem:[#allocation2 + $0x88] sm:$0xff] %vm36_vm1, %v76_v7  ;;  %v79_v9 = vsel %vm77_vm14, %v74_v8, %v76_v7  ;;  %v330_v10 = vld [vmem:[#allocation2 + $0xb0] sm:$0xff] }
  0xb2   :  { %514 = vmatpush1.msra.mxu1 %v330_v10  ;;  %402 = vmatprep.subr.mxu0 %v79_v9 }
  0xb4   :  { %v1037_v11 = vpop.permute.xlu1 %212  ;;  %v211_v12 = vpop.permute.xlu0 %210 }
  0xb5   :  { %v217_v13 = vsel %vm216_vm15, %v211_v12, %v1037_v11  ;;  %222 = vst.msk [vmem:[#allocation2 + $0x88] sm:$0xff] %vm175_vm5, %v211_v12 }
  0xb6   :  { %515 = vmatprep.subr.mxu1 %v217_v13 }
  0xb8   :  { %v59_v15 = vpop.permute.xlu1 %58  ;;  %v72_v17 = vpop.permute.xlu0 %71 }
  0xb9   :  { %v78_v18 = vsel %vm77_vm14, %v72_v17, %v74_v8 }
  0xba   :  { %403 = vmatpush1.msra.mxu0 %v78_v18 }
  0xbc   :  { %v196_v19 = vpop.permute.xlu1 %195  ;;  %v61_v21 = vpop.permute.xlu0 %60  ;;  %v325_v22 = vld [vmem:[#allocation2 + $0x88] sm:$0xff] }
  0xbd   :  { %v64_v23 = vsel %vm62_vm0, %v59_v15, %v61_v21  ;;  %70 = vst.msk [vmem:[#allocation2 + $0x60] sm:$0xff] %vm36_vm1, %v61_v21  ;;  %516 = vmatpush1.msra.mxu1 %v325_v22 }
  0xbe   :  { %207 = vst.msk [vmem:[#allocation2 + $0x60] sm:$0xff] %vm175_vm5, %v196_v19  ;;  %404 = vmatprep.subr.mxu0 %v64_v23 }
  0xc0   :  { %v57_v24 = vpop.permute.xlu1 %56  ;;  %v1045_v25 = vpop.permute.xlu0 %197 }
  0xc1   :  { %v63_v26 = vsel %vm62_vm0, %v57_v24, %v59_v15  ;;  %v202_v27 = vsel %vm201_vm3, %v196_v19, %v1045_v25 }
  0xc2   :  { %405 = vmatpush1.msra.mxu0 %v63_v26  ;;  %517 = vmatprep.subr.mxu1 %v202_v27 }
  0xc4   :  { %v46_v28 = vpop.permute.xlu1 %45  ;;  %v44_v29 = vpop.permute.xlu0 %43 }
  0xc5   :  { %55 = vst.msk [vmem:[#allocation2 + $0x38] sm:$0xff] %vm36_vm1, %v46_v28  ;;  %v49_v30 = vsel %vm47_vm4, %v44_v29, %v46_v28  ;;  %v320_v31 = vld [vmem:[#allocation2 + $0x60] sm:$0xff] }
  0xc6   :  { %518 = vmatpush1.msra.mxu1 %v320_v31  ;;  %406 = vmatprep.subr.mxu0 %v49_v30 }
  0xc8   :  { %v183_v32 = vpop.permute.xlu1 %182  ;;  %v181_v33 = vpop.permute.xlu0 %180 }
  0xc9   :  { %v187_v34 = vsel %vm186_vm6, %v181_v33, %v183_v32  ;;  %192 = vst.msk [vmem:[#allocation2 + $0x38] sm:$0xff] %vm175_vm5, %v181_v33 }
  0xca   :  { %519 = vmatprep.subr.mxu1 %v187_v34 }
  0xcc   :  { %v165_v35 = vpop.permute.xlu1 %164  ;;  %v42_v36 = vpop.permute.xlu0 %41 }
  0xcd   :  { %176 = vst.msk [vmem:[#allocation2 + $0x10] sm:$0xff] %vm175_vm5, %v165_v35  ;;  %v48_v37 = vsel %vm47_vm4, %v42_v36, %v44_v29 }
  0xce   :  { %407 = vmatpush1.msra.mxu0 %v48_v37 }
  0xcf   :  { %408 = vmatprep.subr.mxu0 %v955_v14  ;;  %v347_v14 = vld [vmem:[#allocation2 + $0x138] sm:$0xff] }
  0xd0   :  { %v245_v39 = vpop.permute.xlu1 %244  ;;  %v167_v40 = vpop.permute.xlu0 %166  ;;  %v315_v41 = vld [vmem:[#allocation2 + $0x38] sm:$0xff]  ;;  %409 = vmatpush1.msra.mxu0 %v961_v16 }
  0xd1   :  { %v248_v43 = vsel %vm246_vm11, %v1023_v56, %v245_v39  ;;  %v170_v44 = vsel %vm36_vm1, %v165_v35, %v167_v40  ;;  %520 = vmatpush1.msra.mxu1 %v315_v41  ;;  %834 = vmatprep.subr.mxu0 %v352_v42  ;;  %v1095_v56 = vld [vmem:[%s1280_s1 + $0x10] sm:$0xff] }
  0xd2   :  { %254 = vst.msk [vmem:[#allocation2 + $0xe8] sm:$0xff] %vm178_vm2, %v248_v43  ;;  %793 = vmatmul.mubr.msk.f32.vlgmr.msra.gmra.mxu0 %vm353_vm7, %v1059_v38  ;;  %521 = vmatprep.subr.mxu1 %v170_v44 }
  0xd3   :  { %835 = vmatpush3.msra.mxu0 %v352_v42  ;;  %448 = vmatprep.mubr.f32.mxu0 %v914_v20 }
  0xd4   :  { %v215_v45 = vpop.permute.xlu1 %214  ;;  %v230_v16 = vpop.permute.xlu0 %229  ;;  %v310_v46 = vld [vmem:[#allocation2 + $0x10] sm:$0xff]  ;;  %836 = vmatprep.subr.mxu0 %v347_v14 }
  0xd5   :  { %v218_v47 = vsel %vm216_vm15, %v1037_v11, %v215_v45  ;;  %v233_v48 = vsel %vm231_vm13, %v1031_v4, %v230_v16  ;;  %522 = vmatpush1.msra.mxu1 %v310_v46  ;;  %837 = vmatpush3.msra.mxu0 %v347_v14  ;;  %v307_v4 = vld [vmem:[%s1280_s1 + $0x38] sm:$0xff] }
  0xd6   :  { %224 = vst.msk [vmem:[#allocation2 + $0x98] sm:$0xff] %vm178_vm2, %v218_v47  ;;  %239 = vst.msk [vmem:[#allocation2 + $0xc0] sm:$0xff] %vm178_vm2, %v233_v48  ;;  %801 = vmatmul.mubr.msk.f32.vlgmr.msra.gmra.mxu1 %vm353_vm7, %v1059_v38  ;;  %864 = vmatprep.subr.mxu1 %v352_v42 }
  0xd7   :  { %873 = vmatpush3.msra.mxu1 %v352_v42  ;;  %838 = vmatprep.subr.mxu0 %v342_v49 }
  0xd8   :  { %v185_v51 = vpop.permute.xlu1 %184  ;;  %v200_v52 = vpop.permute.xlu0 %199  ;;  %865 = vmatprep.subr.mxu1 %v347_v14  ;;  %839 = vmatpush3.msra.mxu0 %v342_v49 }
  0xd9   :  { %v188_v53 = vsel %vm186_vm6, %v183_v32, %v185_v51  ;;  %v203_v54 = vsel %vm201_vm3, %v1045_v25, %v200_v52  ;;  %794 = vmatmul.mubr.msk.f32.gmra.mxu0 %vm353_vm7, %v1080_v50  ;;  %561 = vmatprep.mubr.f32.mxu1 %v914_v20  ;;  %v337_v55 = vld [vmem:[#allocation2 + $0xe8] sm:$0xff] }
  0xda   :  { %194 = vst.msk [vmem:[#allocation2 + $0x48] sm:$0xff] %vm178_vm2, %v188_v53  ;;  %209 = vst.msk [vmem:[#allocation2 + $0x70] sm:$0xff] %vm178_vm2, %v203_v54  ;;  %874 = vmatpush3.msra.mxu1 %v347_v14  ;;  %840 = vmatprep.subr.mxu0 %v337_v55 }
  0xdb   :  { %802 = vmatmul.mubr.msk.f32.gmra.mxu1 %vm353_vm7, %v1080_v50  ;;  %866 = vmatprep.subr.mxu1 %v342_v49 }
  0xdc   :  { %v169_v57 = vpop.permute.xlu0 %168  ;;  %841 = vmatpush3.msra.mxu0 %v337_v55  ;;  %875 = vmatpush3.msra.mxu1 %v342_v49 }
  0xdd   :  { %v171_v58 = vsel %vm36_vm1, %v167_v40, %v169_v57  ;;  %v332_v59 = vld [vmem:[#allocation2 + $0xc0] sm:$0xff]  ;;  %454 = vmatprep.mubr.f32.mxu0 %v914_v20  ;;  %867 = vmatprep.subr.mxu1 %v337_v55  ;;  %v327_v60 = vld [vmem:[#allocation2 + $0x98] sm:$0xff] }
  0xde   :  { %179 = vst.msk [vmem:[#allocation2 + $0x20] sm:$0xff] %vm178_vm2, %v171_v58  ;;  %842 = vmatprep.subr.mxu0 %v332_v59  ;;  %795 = vmatmul.mubr.msk.f32.gmra.mxu0 %vm353_vm7, %v1095_v56 }
  0xdf   :  { %843 = vmatpush3.msra.mxu0 %v332_v59  ;;  %567 = vmatprep.mubr.f32.mxu1 %v914_v20 }
  0xe0   :  { %876 = vmatpush3.msra.mxu1 %v337_v55  ;;  %844 = vmatprep.subr.mxu0 %v327_v60 }
  0xe1   :  { %803 = vmatmul.mubr.msk.f32.gmra.mxu1 %vm353_vm7, %v1095_v56  ;;  %868 = vmatprep.subr.mxu1 %v332_v59  ;;  %v322_v61 = vld [vmem:[#allocation2 + $0x70] sm:$0xff]  ;;  %v317_v63 = vld [vmem:[#allocation2 + $0x48] sm:$0xff] }
  0xe2   :  { %845 = vmatpush3.msra.mxu0 %v327_v60  ;;  %877 = vmatpush3.msra.mxu1 %v332_v59 }
  0xe3   :  { %846 = vmatprep.subr.mxu0 %v322_v61  ;;  %460 = vmatprep.mubr.f32.mxu0 %v914_v20 }
  0xe4   :  { %869 = vmatprep.subr.mxu1 %v327_v60  ;;  %847 = vmatpush3.msra.mxu0 %v322_v61 }
  0xe5   :  { %796 = vmatmul.mubr.msk.f32.gmra.mxu0 %vm353_vm7, %v303_v62  ;;  %573 = vmatprep.mubr.f32.mxu1 %v914_v20  ;;  %v312_v0 = vld [vmem:[#allocation2 + $0x20] sm:$0xff] }
  0xe6   :  { %878 = vmatpush3.msra.mxu1 %v327_v60  ;;  %848 = vmatprep.subr.mxu0 %v317_v63 }
  0xe7   :  { %804 = vmatmul.mubr.msk.f32.gmra.mxu1 %vm353_vm7, %v303_v62  ;;  %870 = vmatprep.subr.mxu1 %v322_v61 }
  0xe8   :  { %849 = vmatpush3.msra.mxu0 %v317_v63  ;;  %879 = vmatpush3.msra.mxu1 %v322_v61 }
  0xe9   :  { %850 = vmatprep.subr.mxu0 %v312_v0  ;;  %466 = vmatprep.mubr.f32.mxu0 %v914_v20 }
  0xea   :  { %871 = vmatprep.subr.mxu1 %v317_v63  ;;  %851 = vmatpush3.msra.mxu0 %v312_v0 }
  0xeb   :  { %797 = vmatmul.mubr.msk.f32.gmra.mxu0 %vm353_vm7, %v304_v1  ;;  %579 = vmatprep.mubr.f32.mxu1 %v914_v20 }
  0xec   :  { %880 = vmatpush3.msra.mxu1 %v317_v63  ;;  %472 = vmatprep.mubr.f32.mxu0 %v914_v20 }
  0xed   :  { %805 = vmatmul.mubr.msk.f32.gmra.mxu1 %vm353_vm7, %v304_v1  ;;  %872 = vmatprep.subr.mxu1 %v312_v0 }
  0xee   :  { %881 = vmatpush3.msra.mxu1 %v312_v0  ;;  %585 = vmatprep.mubr.f32.mxu1 %v914_v20 }
  0xef   :  { %798 = vmatmul.mubr.msk.f32.gmra.mxu0 %vm353_vm7, %v305_v2 }
  0xf0   :  { %478 = vmatprep.mubr.f32.mxu0 %v914_v20 }
  0xf1   :  { %806 = vmatmul.mubr.msk.f32.gmra.mxu1 %vm353_vm7, %v305_v2 }
  0xf2   :  { %591 = vmatprep.mubr.f32.mxu1 %v914_v20 }
  0xf3   :  { %799 = vmatmul.mubr.msk.f32.gmra.mxu0 %vm353_vm7, %v306_v3 }
  0xf4   :  { %484 = vmatprep.mubr.f32.mxu0 %v914_v20 }
  0xf5   :  { %807 = vmatmul.mubr.msk.f32.gmra.mxu1 %vm353_vm7, %v306_v3 }
  0xf6   :  { %597 = vmatprep.mubr.f32.mxu1 %v914_v20 }
  0xf7   :  { %800 = vmatmul.mubr.msk.f32.gmra.mxu0 %vm353_vm7, %v307_v4 }
  0xf8   :  { %852 = vmatprep.mubr.msk.f32.mxu0 %vm353_vm7, %v1059_v38 }
  0xf9   :  { %808 = vmatmul.mubr.msk.f32.gmra.mxu1 %vm353_vm7, %v307_v4 }
  0xfa   :  { %858 = vmatprep.mubr.msk.f32.mxu1 %vm353_vm7, %v304_v1 }
  0xfb   :  { %853 = vmatmul.mubr.msk.f32.vlgmr.msra.gmra.mxu0 %vm353_vm7, %v1080_v50 }
  0xfc   :  { %855 = vmatprep.mubr.msk.f32.mxu0 %vm353_vm7, %v1095_v56 }
  0xfd   :  { %859 = vmatmul.mubr.msk.f32.vlgmr.msra.gmra.mxu1 %vm353_vm7, %v305_v2 }
  0xfe   :  { %861 = vmatprep.mubr.msk.f32.mxu1 %vm353_vm7, %v306_v3 }
  0xff   :  { %856 = vmatmul.mubr.msk.f32.gmra.mxu0 %vm353_vm7, %v303_v62 }
 0x101   :  { %862 = vmatmul.mubr.msk.f32.gmra.mxu1 %vm353_vm7, %v307_v4 }
 0x192   :  { %v444_v20 = vpop.f32.mrf.mxu0 }
 0x193   :  { %v709_v5 = vmax.f32 %v444_v20, 0.0 }
 0x194   :  { %v446_v6 = vpop.f32.mrf.mxu0 }
 0x195   :  { %749 = vst [vmem:[%s1281_s2] sm:$0xff] %v709_v5  ;;  %v710_v7 = vmax.f32 %v446_v6, 0.0 }
 0x196   :  { %v557_v8 = vpop.f32.mrf.mxu1 }
 0x197   :  { %v711_v9 = vmax.f32 %v557_v8, 0.0  ;;  %750 = vst [vmem:[%s1281_s2 + $0x8] sm:$0xff] %v710_v7 }
 0x198   :  { %v559_v10 = vpop.f32.mrf.mxu1 }
 0x199   :  { %751 = vst [vmem:[%s1281_s2 + $0x10] sm:$0xff] %v711_v9  ;;  %v712_v11 = vmax.f32 %v559_v10, 0.0  ;;  %v450_v12 = vpop.f32.mrf.mxu0 }
 0x19a   :  { %v714_v13 = vmax.f32 %v450_v12, 0.0 }
 0x19b   :  { %752 = vst [vmem:[%s1281_s2 + $0x18] sm:$0xff] %v712_v11  ;;  %v563_v15 = vpop.f32.mrf.mxu1  ;;  %v452_v17 = vpop.f32.mrf.mxu0 }
 0x19c   :  { %754 = vst [vmem:[%s1281_s2 + $0x28] sm:$0xff] %v714_v13  ;;  %v716_v18 = vmax.f32 %v563_v15, 0.0  ;;  %v715_v19 = vmax.f32 %v452_v17, 0.0 }
 0x19d   :  { %v565_v21 = vpop.f32.mrf.mxu1 }
 0x19e   :  { %756 = vst [vmem:[%s1281_s2 + $0x38] sm:$0xff] %v716_v18  ;;  %755 = vst [vmem:[%s1281_s2 + $0x30] sm:$0xff] %v715_v19  ;;  %v717_v22 = vmax.f32 %v565_v21, 0.0  ;;  %v456_v23 = vpop.f32.mrf.mxu0 }
 0x19f   :  { %v719_v24 = vmax.f32 %v456_v23, 0.0 }
 0x1a0   :  { %757 = vst [vmem:[%s1281_s2 + $0x40] sm:$0xff] %v717_v22  ;;  %v458_v25 = vpop.f32.mrf.mxu0 }
 0x1a1   :  { %759 = vst [vmem:[%s1281_s2 + $0x50] sm:$0xff] %v719_v24  ;;  %v569_v26 = vpop.f32.mrf.mxu1  ;;  %v720_v27 = vmax.f32 %v458_v25, 0.0 }
 0x1a2   :  { %v721_v28 = vmax.f32 %v569_v26, 0.0 }
 0x1a3   :  { %760 = vst [vmem:[%s1281_s2 + $0x58] sm:$0xff] %v720_v27  ;;  %v571_v29 = vpop.f32.mrf.mxu1 }
 0x1a4   :  { %761 = vst [vmem:[%s1281_s2 + $0x60] sm:$0xff] %v721_v28  ;;  %v722_v30 = vmax.f32 %v571_v29, 0.0 }
 0x1a5   :  { %v462_v31 = vpop.f32.mrf.mxu0 }
 0x1a6   :  { %762 = vst [vmem:[%s1281_s2 + $0x68] sm:$0xff] %v722_v30  ;;  %v724_v32 = vmax.f32 %v462_v31, 0.0 }
 0x1a7   :  { %v575_v33 = vpop.f32.mrf.mxu1  ;;  %v464_v34 = vpop.f32.mrf.mxu0 }
 0x1a8   :  { %764 = vst [vmem:[%s1281_s2 + $0x78] sm:$0xff] %v724_v32  ;;  %v726_v35 = vmax.f32 %v575_v33, 0.0  ;;  %v725_v36 = vmax.f32 %v464_v34, 0.0 }
 0x1a9   :  { %v577_v37 = vpop.f32.mrf.mxu1 }
 0x1aa   :  { %766 = vst [vmem:[%s1281_s2 + $0x88] sm:$0xff] %v726_v35  ;;  %765 = vst [vmem:[%s1281_s2 + $0x80] sm:$0xff] %v725_v36  ;;  %v727_v38 = vmax.f32 %v577_v37, 0.0 }
 0x1ab   :  { %v468_v39 = vpop.f32.mrf.mxu0 }
 0x1ac   :  { %767 = vst [vmem:[%s1281_s2 + $0x90] sm:$0xff] %v727_v38  ;;  %v729_v40 = vmax.f32 %v468_v39, 0.0 }
 0x1ad   :  { %v581_v41 = vpop.f32.mrf.mxu1  ;;  %v470_v42 = vpop.f32.mrf.mxu0 }
 0x1ae   :  { %769 = vst [vmem:[%s1281_s2 + $0xa0] sm:$0xff] %v729_v40  ;;  %v731_v43 = vmax.f32 %v581_v41, 0.0  ;;  %v730_v44 = vmax.f32 %v470_v42, 0.0 }
 0x1af   :  { %v583_v14 = vpop.f32.mrf.mxu1  ;;  %v474_v45 = vpop.f32.mrf.mxu0 }
 0x1b0   :  { %771 = vst [vmem:[%s1281_s2 + $0xb0] sm:$0xff] %v731_v43  ;;  %770 = vst [vmem:[%s1281_s2 + $0xa8] sm:$0xff] %v730_v44  ;;  %v732_v16 = vmax.f32 %v583_v14, 0.0  ;;  %v734_v46 = vmax.f32 %v474_v45, 0.0 }
 0x1b1   :  { %v587_v47 = vpop.f32.mrf.mxu1  ;;  %v476_v48 = vpop.f32.mrf.mxu0 }
 0x1b2   :  { %772 = vst [vmem:[%s1281_s2 + $0xb8] sm:$0xff] %v732_v16  ;;  %774 = vst [vmem:[%s1281_s2 + $0xc8] sm:$0xff] %v734_v46  ;;  %v736_v49 = vmax.f32 %v587_v47, 0.0  ;;  %v735_v50 = vmax.f32 %v476_v48, 0.0 }
 0x1b3   :  { %v589_v51 = vpop.f32.mrf.mxu1  ;;  %v480_v52 = vpop.f32.mrf.mxu0 }
 0x1b4   :  { %776 = vst [vmem:[%s1281_s2 + $0xd8] sm:$0xff] %v736_v49  ;;  %775 = vst [vmem:[%s1281_s2 + $0xd0] sm:$0xff] %v735_v50  ;;  %v737_v53 = vmax.f32 %v589_v51, 0.0  ;;  %v739_v54 = vmax.f32 %v480_v52, 0.0 }
 0x1b5   :  { %v593_v55 = vpop.f32.mrf.mxu1  ;;  %v482_v56 = vpop.f32.mrf.mxu0 }
 0x1b6   :  { %777 = vst [vmem:[%s1281_s2 + $0xe0] sm:$0xff] %v737_v53  ;;  %779 = vst [vmem:[%s1281_s2 + $0xf0] sm:$0xff] %v739_v54  ;;  %v741_v57 = vmax.f32 %v593_v55, 0.0  ;;  %v740_v58 = vmax.f32 %v482_v56, 0.0 }
 0x1b7   :  { %v595_v59 = vpop.f32.mrf.mxu1  ;;  %v486_v60 = vpop.f32.mrf.mxu0 }
 0x1b8   :  { %781 = vst [vmem:[%s1281_s2 + $0x100] sm:$0xff] %v741_v57  ;;  %780 = vst [vmem:[%s1281_s2 + $0xf8] sm:$0xff] %v740_v58  ;;  %v742_v61 = vmax.f32 %v595_v59, 0.0  ;;  %v744_v62 = vmax.f32 %v486_v60, 0.0 }
 0x1b9   :  { %v599_v63 = vpop.f32.mrf.mxu1  ;;  %v488_v0 = vpop.f32.mrf.mxu0 }
 0x1ba   :  { %782 = vst [vmem:[%s1281_s2 + $0x108] sm:$0xff] %v742_v61  ;;  %784 = vst [vmem:[%s1281_s2 + $0x118] sm:$0xff] %v744_v62  ;;  %v746_v1 = vmax.f32 %v599_v63, 0.0  ;;  %v745_v2 = vmax.f32 %v488_v0, 0.0 }
 0x1bb   :  { %v601_v3 = vpop.f32.mrf.mxu1  ;;  %v854_v4 = vpop.f32.mrf.mxu0 }
 0x1bc   :  { %786 = vst [vmem:[%s1281_s2 + $0x128] sm:$0xff] %v746_v1  ;;  %785 = vst [vmem:[%s1281_s2 + $0x120] sm:$0xff] %v745_v2  ;;  %v747_v20 = vmax.f32 %v601_v3, 0.0  ;;  %v718_v5 = vmax.f32 %v854_v4, 0.0 }
 0x1bd   :  { %v860_v6 = vpop.f32.mrf.mxu1  ;;  %v670_v7 = vpop.f32.mrf.mxu0 }
 0x1be   :  { %787 = vst [vmem:[%s1281_s2 + $0x130] sm:$0xff] %v747_v20  ;;  %758 = vst.msk [vmem:[%s1281_s2 + $0x48] sm:$0xff] %vm178_vm2, %v718_v5  ;;  %v738_v8 = vmax.f32 %v860_v6, 0.0  ;;  %v713_v9 = vmax.f32 %v670_v7, 0.0 }
 0x1bf   :  { %v690_v10 = vpop.f32.mrf.mxu1  ;;  %v857_v11 = vpop.f32.mrf.mxu0 }
 0x1c0   :  { %778 = vst.msk [vmem:[%s1281_s2 + $0xe8] sm:$0xff] %vm178_vm2, %v738_v8  ;;  %753 = vst.msk [vmem:[%s1281_s2 + $0x20] sm:$0xff] %vm178_vm2, %v713_v9  ;;  %v733_v12 = vmax.f32 %v690_v10, 0.0  ;;  %v728_v13 = vmax.f32 %v857_v11, 0.0 }
 0x1c1   :  { %v863_v15 = vpop.f32.mrf.mxu1  ;;  %v680_v17 = vpop.f32.mrf.mxu0 }
 0x1c2   :  { %773 = vst.msk [vmem:[%s1281_s2 + $0xc0] sm:$0xff] %vm178_vm2, %v733_v12  ;;  %768 = vst.msk [vmem:[%s1281_s2 + $0x98] sm:$0xff] %vm178_vm2, %v728_v13  ;;  %v748_v18 = vmax.f32 %v863_v15, 0.0  ;;  %v723_v19 = vmax.f32 %v680_v17, 0.0 }
 0x1c3   :  { %v700_v21 = vpop.f32.mrf.mxu1 }
 0x1c4   :  { %788 = vst.msk [vmem:[%s1281_s2 + $0x138] sm:$0xff] %vm178_vm2, %v748_v18  ;;  %763 = vst.msk [vmem:[%s1281_s2 + $0x70] sm:$0xff] %vm178_vm2, %v723_v19  ;;  %v743_v22 = vmax.f32 %v700_v21, 0.0 }
 0x1c6   :  { %783 = vst.msk [vmem:[%s1281_s2 + $0x110] sm:$0xff] %vm178_vm2, %v743_v22 }

</bundles_post_ra>
